<compile_context>
chip_gen: v7x
topology: tpu7x:2x2x1
jax: 0.10.0
libtpu: 0.0.40
codegen_flags: <defaults>
</compile_context>

<pallas_src>
import jax
import jax.numpy as jnp
from jax.experimental import pallas as pl
from jax.experimental.pallas import tpu as pltpu

_VMEM_LIMIT = 32 * 1024 * 1024          # valid on every generation
_TARGET_BLOCK_BYTES = 4 * 1024 * 1024   # ~4 MiB blocks -> near-roofline DMA


def _copy_kernel(x_ref, o_ref):
    # Lane/sublane-dense identity copy of one VMEM block.
    o_ref[...] = x_ref[...]


def _sublane_multiple(dtype):
    # Full sublane packing: 8 rows/vreg at 32-bit, 16 at 16-bit, 32 at 8-bit.
    itemsize = jnp.dtype(dtype).itemsize
    return max(8, 32 // itemsize)


def _pick_slab_cols(total, sub):
    """Largest lane-dense column width (multiple of 128) dividing `total`,
    preferring widths that leave rows >= sublane multiple (dense vregs)."""
    best = None
    for c in (4096, 2048, 1024, 512, 256, 128):
        if total % c == 0:
            if best is None:
                best = c
            if total // c >= sub:
                return c
    return best


def _tiled_identity_copy(slab):
    """DMA-bound tiled identity copy of a synthetic 2-D slab (rows, cols)."""
    rows, cols = slab.shape
    dtype = slab.dtype
    itemsize = jnp.dtype(dtype).itemsize
    sub = _sublane_multiple(dtype)

    # Row tile sized for ~4 MiB blocks, sublane-aligned.
    tn = max(sub, (_TARGET_BLOCK_BYTES // (cols * itemsize)) // sub * sub)
    if rows < sub:
        tn = rows                      # full-extent row block (always legal)
    else:
        tn = min(tn, max(sub, rows // sub * sub))
        # v7x shards "parallel" grid axes across its 2 TensorCores: make sure
        # there are >= 2 grid steps whenever the copy is big enough to matter.
        if (pl.cdiv(rows, tn) < 2 and rows >= 2 * sub
                and rows * cols * itemsize > _TARGET_BLOCK_BYTES):
            half = (rows + 1) // 2
            tn = max(sub, ((half + sub - 1) // sub) * sub)

    grid = (pl.cdiv(rows, tn),)        # ragged last block masked by Pallas

    return pl.pallas_call(
        _copy_kernel,
        out_shape=jax.ShapeDtypeStruct((rows, cols), dtype),
        grid=grid,
        in_specs=[pl.BlockSpec((tn, cols), lambda i: (i, 0))],
        out_specs=pl.BlockSpec((tn, cols), lambda i: (i, 0)),
        compiler_params=pltpu.CompilerParams(
            dimension_semantics=("parallel",),
            vmem_limit_bytes=_VMEM_LIMIT,
        ),
    )(slab)


def _ragged_row_copy(x_row):
    """Fallback for element counts not divisible by 128: single-row slab with
    a cdiv-padded lane grid.  Sublane-sparse but VMEM-bounded and correct."""
    _, total = x_row.shape
    tf = min(32768, pl.cdiv(total, 128) * 128)
    grid = (pl.cdiv(total, tf),)
    return pl.pallas_call(
        _copy_kernel,
        out_shape=jax.ShapeDtypeStruct((1, total), x_row.dtype),
        grid=grid,
        in_specs=[pl.BlockSpec((1, tf), lambda j: (0, j))],
        out_specs=pl.BlockSpec((1, tf), lambda j: (0, j)),
        compiler_params=pltpu.CompilerParams(
            dimension_semantics=("parallel",),
            vmem_limit_bytes=_VMEM_LIMIT,
        ),
    )(x_row)


def pallas_flatten(x, full=False, donate_input=False):
    """Equivalent of Flatten(full).forward(x) for any N-D input."""
    n = x.shape[0]
    feat = 1
    for d in x.shape[1:]:
        feat *= d
    total = n * feat
    out_shape = (total,) if full else (n, feat)

    if donate_input:
        # A donated input means there is nothing to copy: the flatten is a
        # free metadata reshape (exactly torch .view semantics).
        return x.reshape(out_shape)

    sub = _sublane_multiple(x.dtype)
    cols = _pick_slab_cols(total, sub)
    if cols is None:
        # TODO(synk): element counts not divisible by 128 use a sublane-sparse
        # fallback slab; correct and VMEM-bounded, but below HBM roofline.
        slab = _ragged_row_copy(x.reshape(1, total))
    else:
        # Synthetic lane-dense slab; reshapes to/from it are metadata-only.
        slab = _tiled_identity_copy(x.reshape(total // cols, cols))
    return slab.reshape(out_shape)


if __name__ == "__main__":
    key = jax.random.PRNGKey(0)
    # Small NCHW input consistent with a conv feature map: batch=2, C=4, 16x16.
    x = jax.random.normal(key, (2, 4, 16, 16), dtype=jnp.float32)

    # full=False path: (2, 1024)
    y = jax.block_until_ready(pallas_flatten(x, full=False))
    assert y.shape == (2, 4 * 16 * 16)
    assert y.dtype == x.dtype
    assert bool(jnp.all(y == x.reshape(x.shape[0], -1)))

    # full=True path: (2048,)
    y_full = jax.block_until_ready(pallas_flatten(x, full=True))
    assert y_full.shape == (2 * 4 * 16 * 16,)
    assert bool(jnp.all(y_full == x.reshape(-1)))

    # Dtype-aware sublane packing (bf16 -> 16-row multiples).
    x_bf16 = x.astype(jnp.bfloat16)
    y_bf16 = jax.block_until_ready(pallas_flatten(x_bf16, full=False))
    assert bool(jnp.all(y_bf16 == x_bf16.reshape(x_bf16.shape[0], -1)))

    # Robustness: element count not divisible by 128 (fallback path).
    x_odd = jax.random.normal(key, (2, 3, 15, 15), dtype=jnp.float32)
    y_odd = jax.block_until_ready(pallas_flatten(x_odd, full=False))
    assert y_odd.shape == (2, 3 * 15 * 15)
    assert bool(jnp.all(y_odd == x_odd.reshape(x_odd.shape[0], -1)))

    print("KERNEL_OK")
</pallas_src>

<mosaic_0001>
module attributes {stable_mosaic.version = 11 : i64} {
  func.func @_copy_kernel(%arg0: i32, %arg1: memref<8x256xf32, #tpu.memory_space<vmem>>, %arg2: memref<8x256xf32, #tpu.memory_space<vmem>>) attributes {dimension_semantics = [#tpu.dimension_semantics<parallel>], iteration_bounds = array<i64: 1>, scalar_prefetch = 0 : i64, scratch_operands = 0 : i64, tpu.core_type = #tpu.core_type<tc>, window_params = [{transform_indices = @transform_0, window_bounds = array<i64: 8, 256>}, {transform_indices = @transform_1, window_bounds = array<i64: 8, 256>}]} {
    %c0 = arith.constant 0 : index
    %c0_0 = arith.constant 0 : index
    %0 = vector.load %arg1[%c0, %c0_0] : memref<8x256xf32, #tpu.memory_space<vmem>>, vector<8x256xf32>
    %c0_1 = arith.constant 0 : index
    %c0_2 = arith.constant 0 : index
    %1 = vector.load %arg2[%c0_1, %c0_2] : memref<8x256xf32, #tpu.memory_space<vmem>>, vector<8x256xf32>
    tpu.vector_store %arg2[%c0_1, %c0_2], %0 {strides = array<i32>} : memref<8x256xf32, #tpu.memory_space<vmem>>, vector<8x256xf32>,
    return
  }
  func.func @transform_0(%arg0: i32) -> (i32, i32) {
    %c0_i32 = arith.constant 0 : i32
    %c0_i32_0 = arith.constant 0 : i32
    return %arg0, %c0_i32 : i32, i32
  }
  func.func @transform_1(%arg0: i32) -> (i32, i32) {
    %c0_i32 = arith.constant 0 : i32
    %c0_i32_0 = arith.constant 0 : i32
    return %arg0, %c0_i32 : i32, i32
  }
}

</mosaic_0001>

<bundles_post_ra>
// kernel: tpu_custom_call.1
= control target key start
LH: loop header
LB: loop body
LE: loop exit
PB: predicated region body
PF: predicated region fallthrough
CT: control target
= control target key end

     0   :  { %6 = vsyncpa [#allocation3], 0  ;;  %s126_s0 = inlined_call_operand.hbm [shape: f32[8,256], index: 0, kind: input, shape index: {}]   ;;  %s127_s1 = inlined_call_operand.hbm [shape: f32[8,256], index: 1, kind: output, shape index: {}]  }
   0x1   :  { %7 = vsyncpa [#allocation4], 0  ;;  %s90_s6 = smov [#allocation2]   ;;  %s42_s10 = scalar_lea.hbm %s126_s0, 256 }
   0x2   :  { %s14_s7 = sshll.u32 %s90_s6, 4  ;;  %p43_p0 = scmp.ne.s32.totalorder %s126_s0, %s42_s10  ;;  %s15_s7 = int_to_ptr.vmem [resolvable:$true] %s14_s7 }
   0x3   :  { %p46_p1 = scmp.lt.u32.totalorder %s42_s10, %s126_s0 }
   0x5   :  { %p48_p2 = pnand %p46_p1, %p43_p0 }
   0x7   :  { %51 = shalt.err (!%p48_p2)
}
   0x8   :  { %s52_s15 = scalar_lea.vmem %s15_s7, 256  ;;  %p57_p4 = scmp.lt.s32.totalorder %s15_s7, %s15_s7 }
   0x9   :  { %p53_p3 = scmp.ne.s32.totalorder %s15_s7, %s52_s15  ;;  %p58_p5 = scmp.lt.s32.totalorder %s52_s15, %s52_s15 }
   0xb   :  { %p59_p6 = por %p58_p5, %p57_p4 }
   0xd   :  { %p60_p7 = pnand %p59_p6, %p53_p3 }
   0xf   :  { %63 = shalt.err (!%p60_p7)
}
  0x10   :  { %17 = dma.hbm_to_vmem [thread:$0]  %s126_s0, 256, %s15_s7, [#allocation3]  }
  0x11   :  { %86 = dma.done.wait [#allocation3], 256  }
  0x12   :  { %87 = vsyncadd [#allocation3], 4294967040  ;;  %s91_s18 = smov [#allocation5]   ;;  %v21_v0 = vld [vmem:[#allocation2] sm:$0xff]  ;;  %v22_v1 = vld [vmem:[#allocation2 + $0x8] sm:$0xff] }
  0x13   :  { %s31_s19 = sshll.u32 %s91_s18, 4  ;;  %23 = vst [vmem:[#allocation5] sm:$0xff] %v21_v0  ;;  %24 = vst [vmem:[#allocation5 + $0x8] sm:$0xff] %v22_v1  ;;  %s32_s19 = int_to_ptr.vmem [resolvable:$true] %s31_s19 }
  0x14   :  { %s64_s20 = scalar_lea.vmem %s32_s19, 256  ;;  %p69_p9 = scmp.lt.s32.totalorder %s32_s19, %s32_s19 }
  0x15   :  { %p65_p8 = scmp.ne.s32.totalorder %s32_s19, %s64_s20  ;;  %p70_p10 = scmp.lt.s32.totalorder %s64_s20, %s64_s20 }
  0x17   :  { %p71_p11 = por %p70_p10, %p69_p9 }
  0x19   :  { %p72_p12 = pnand %p71_p11, %p65_p8 }
  0x1b   :  { %75 = shalt.err (!%p72_p12)
}
  0x1c   :  { %s76_s0 = scalar_lea.hbm %s127_s1, 256 }
  0x1d   :  { %p77_p13 = scmp.ne.s32.totalorder %s127_s1, %s76_s0  ;;  %p80_p0 = scmp.lt.u32.totalorder %s76_s0, %s127_s1 }
  0x1f   :  { %p82_p1 = pnand %p80_p0, %p77_p13 }
  0x21   :  { %85 = shalt.err (!%p82_p1)
}
  0x22   :  { %34 = dma.vmem_to_hbm [thread:$0]  %s32_s19, 256, %s127_s1, [#allocation4]  }
  0x23   :  { %88 = dma.done.wait [#allocation4], 256  }
  0x24   :  { %89 = vsyncadd [#allocation4], 4294967040 }
  0x25   :  { %38 = vsyncpa [#allocation3], 1 }
  0x26   :  { %39 = vsyncpa [#allocation4], 1 }

</bundles_post_ra>
